<compile_context>
chip_gen: v5e
topology: v5e:2x2
jax: 0.10.0
libtpu: 0.0.40
codegen_flags: <defaults>
</compile_context>

<pallas_src>
import math
import functools

import jax
import jax.numpy as jnp
from jax.experimental import pallas as pl
from jax.experimental.pallas import tpu as pltpu


_FUSED_VMEM_BUDGET = 24 * 1024 * 1024  # bytes for (in + out) double-buffered blocks


def _vmem_limit(*block_bytes):
    """Scoped-VMEM request: double-buffered blocks + slack, clamped to a
    value that is safe on v5e/v6e (128 MiB phys) and v7x (64 MiB phys)."""
    need = sum(2 * int(b) for b in block_bytes) + (2 << 20)
    return int(min(max(need, 16 << 20), 48 << 20))


def _choose_batch_tile(B, per_batch_bytes, target_bytes=4 << 20):
    """Fold batch items into a block (~target_bytes) to amortize grid-step
    overhead, but keep >= 2 grid steps when B allows (v7x has 2 TCs)."""
    bt = max(1, min(B, target_bytes // max(per_batch_bytes, 1)))
    if B >= 2:
        while bt > 1 and B // bt < 2:
            bt -= 1
    while B % bt:  # keep blocks evenly dividing B (no padded edge batches)
        bt -= 1
    return int(bt)


# ----------------------------------------------------------------------------
# Fused single-pass kernel: block = (Bt, C, H*W)
# ----------------------------------------------------------------------------
def _eca_fused_kernel(w_ref, x_ref, o_ref, *, k, pad):
    # w_ref: SMEM (k,) f32 Conv1d weights (no bias)
    # x_ref/o_ref: VMEM (Bt, C, HW) in the input dtype
    x = x_ref[...]
    C = x.shape[1]

    # Global average pool over the lane (spatial) axis; accumulate in f32
    # without materializing a full f32 copy of the block (XLU lane reduce).
    pooled = jnp.mean(x, axis=-1, dtype=jnp.float32)          # (Bt, C)

    # 1-D conv across the channel axis, zero padded (Conv1d(1,1,k,bias=False)).
    # k is tiny (3 or 5), so a small unrolled shift-multiply-add is cheapest.
    if pad > 0:
        zeros = jnp.zeros((pooled.shape[0], pad), jnp.float32)
        padded = jnp.concatenate([zeros, pooled, zeros], axis=-1)
    else:
        padded = pooled
    y = jnp.zeros_like(pooled)
    for j in range(k):
        y = y + w_ref[j] * padded[:, j:j + C]

    attn = jax.nn.sigmoid(y)                                   # (Bt, C) f32, EUP
    # Rescale in the input dtype (only the tiny attn vector is cast).
    o_ref[...] = x * attn.astype(x.dtype)[:, :, None]


def _eca_fused(x3, w, bt, *, k, pad):
    B, C, HW = x3.shape
    itemsize = x3.dtype.itemsize
    block_bytes = bt * C * HW * itemsize
    cost = pl.CostEstimate(
        flops=3 * B * C * HW,
        transcendentals=B * C,
        bytes_accessed=2 * B * C * HW * itemsize,
    )
    kernel = functools.partial(_eca_fused_kernel, k=k, pad=pad)
    return pl.pallas_call(
        kernel,
        out_shape=jax.ShapeDtypeStruct((B, C, HW), x3.dtype),
        grid=(B // bt,),
        in_specs=[
            pl.BlockSpec(memory_space=pltpu.MemorySpace.SMEM),      # conv weights
            pl.BlockSpec((bt, C, HW), lambda b: (b, 0, 0)),         # x batch tile
        ],
        out_specs=pl.BlockSpec((bt, C, HW), lambda b: (b, 0, 0)),
        compiler_params=pltpu.CompilerParams(
            dimension_semantics=("parallel",),
            vmem_limit_bytes=_vmem_limit(block_bytes, block_bytes),
        ),
        cost_estimate=cost,
    )(w, x3)


# ----------------------------------------------------------------------------
# Two-pass path for shapes whose (C, H*W) block would not fit VMEM comfortably
# ----------------------------------------------------------------------------
def _pool_sum_kernel(x_ref, sum_ref, *, hw, t):
    s = pl.program_id(0)

    @pl.when(s == 0)
    def _():
        sum_ref[...] = jnp.zeros_like(sum_ref)

    xf = x_ref[...].astype(jnp.float32)                        # (B, C, t) tile only
    if hw % t:
        # Mask the (garbage) padded tail of the last partial spatial tile.
        idx = jax.lax.broadcasted_iota(jnp.int32, xf.shape, 2) + s * t
        xf = jnp.where(idx < hw, xf, 0.0)
    sum_ref[...] += jnp.sum(xf, axis=-1)


def _scale_kernel(x_ref, a_ref, o_ref):
    o_ref[...] = x_ref[...] * a_ref[...].astype(x_ref.dtype)


def _eca_two_pass(x3, w, *, k, pad):
    B, C, HW = x3.shape
    itemsize = x3.dtype.itemsize

    # ---- Pass 1: tiled global-average-pool accumulation into (B, C) f32 ----
    if B * C * HW * itemsize <= (4 << 20):
        t = HW                                                 # single step, full dim
    else:
        t = max(128, ((4 << 20) // (B * C * itemsize)) // 128 * 128)
        if t >= HW:
            t = HW                                             # full dim always legal
    in_block1 = B * C * t * itemsize
    sums = pl.pallas_call(
        functools.partial(_pool_sum_kernel, hw=HW, t=t),
        out_shape=jax.ShapeDtypeStruct((B, C), jnp.float32),
        grid=(pl.cdiv(HW, t),),
        in_specs=[pl.BlockSpec((B, C, t), lambda s: (0, 0, s))],
        out_specs=pl.BlockSpec((B, C), lambda s: (0, 0)),      # resident accumulator
        compiler_params=pltpu.CompilerParams(
            dimension_semantics=("arbitrary",),
            vmem_limit_bytes=_vmem_limit(in_block1, B * C * 4),
        ),
        cost_estimate=pl.CostEstimate(
            flops=B * C * HW, transcendentals=0,
            bytes_accessed=B * C * HW * itemsize),
    )(x3)
    pooled = sums / jnp.float32(HW)                            # (B, C) f32

    # ---- Tiny 1-D channel conv + sigmoid in plain JAX (negligible work) ----
    padded = jnp.pad(pooled, ((0, 0), (pad, pad)))
    y = sum(w[j] * padded[:, j:j + C] for j in range(k))
    attn = jax.nn.sigmoid(y)                                   # (B, C) f32

    # ---- Pass 2: tiled broadcast-multiply over flattened (B*C, HW) ----
    BC = B * C
    x2 = x3.reshape(BC, HW)
    a2 = attn.reshape(BC, 1)
    R = BC if BC <= 256 else 256
    T = HW if HW <= 2048 else 2048
    blk2 = R * T * itemsize
    out2 = pl.pallas_call(
        _scale_kernel,
        out_shape=jax.ShapeDtypeStruct((BC, HW), x3.dtype),
        grid=(pl.cdiv(BC, R), pl.cdiv(HW, T)),
        in_specs=[
            pl.BlockSpec((R, T), lambda r, s: (r, s)),
            pl.BlockSpec((R, 1), lambda r, s: (r, 0)),
        ],
        out_specs=pl.BlockSpec((R, T), lambda r, s: (r, s)),
        compiler_params=pltpu.CompilerParams(
            dimension_semantics=("parallel", "parallel"),
            vmem_limit_bytes=_vmem_limit(blk2, R * 4, blk2),
        ),
        cost_estimate=pl.CostEstimate(
            flops=B * C * HW, transcendentals=0,
            bytes_accessed=2 * B * C * HW * itemsize),
    )(x2, a2)
    return out2.reshape(B, C, HW)


# ----------------------------------------------------------------------------
# Public wrapper
# ----------------------------------------------------------------------------
def ecanet_forward(x, w, *, force_two_pass=False):
    """x: (B, C, H, W), w: (k,) Conv1d(1,1,k,bias=False) weights."""
    B, C, H, W = x.shape
    HW = H * W
    k = int(w.shape[0])
    pad = (k - 1) // 2
    wf = w.astype(jnp.float32)

    x3 = x.reshape(B, C, HW)                                   # lane-dense layout
    per_batch_bytes = C * HW * x.dtype.itemsize
    bt = _choose_batch_tile(B, per_batch_bytes)
    block_bytes = bt * per_batch_bytes

    if force_two_pass or (4 * block_bytes > _FUSED_VMEM_BUDGET):
        out3 = _eca_two_pass(x3, wf, k=k, pad=pad)
    else:
        out3 = _eca_fused(x3, wf, bt, k=k, pad=pad)
    return out3.reshape(B, C, H, W)


def ecanet_ref(x, w):
    """Pure-JAX reference matching the PyTorch forward exactly."""
    pooled = jnp.mean(x.astype(jnp.float32), axis=(2, 3))      # (B, C)
    k = int(w.shape[0])
    pad = (k - 1) // 2
    C = pooled.shape[1]
    padded = jnp.pad(pooled, ((0, 0), (pad, pad)))
    y = sum(w[j] * padded[:, j:j + C] for j in range(k))
    attn = jax.nn.sigmoid(y)
    return (x.astype(jnp.float32) * attn[:, :, None, None]).astype(x.dtype)


if __name__ == "__main__":
    B, C, H, W = 2, 8, 16, 16
    gamma, b = 2, 1

    # kernel_size exactly as in ECANet.__init__ (C=8 -> k=3)
    kernel_size = int(abs((math.log(C, 2) + b) / gamma))
    kernel_size = kernel_size if kernel_size % 2 else kernel_size + 1

    key = jax.random.PRNGKey(0)
    kx, kw = jax.random.split(key)
    x = jax.random.normal(kx, (B, C, H, W), dtype=jnp.float32)
    # Deterministic synthetic Conv1d(1,1,k,bias=False) weights.
    w = jax.random.normal(kw, (kernel_size,), dtype=jnp.float32) * 0.5

    ref = ecanet_ref(x, w)

    # Fused single-pass path (the one real ECA shapes with modest C*H*W take).
    out = jax.block_until_ready(ecanet_forward(x, w))
    assert out.shape == (B, C, H, W)
    assert jnp.allclose(out, ref, atol=1e-5, rtol=1e-5), "fused path mismatch"

    # Also exercise the two-pass (large-shape / v7x VMEM-constrained) path.
    out2 = jax.block_until_ready(ecanet_forward(x, w, force_two_pass=True))
    assert jnp.allclose(out2, ref, atol=1e-5, rtol=1e-5), "two-pass path mismatch"

    print("KERNEL_OK")
</pallas_src>

<mosaic_0001>
module attributes {stable_mosaic.version = 11 : i64} {
  func.func @_eca_fused_kernel(%arg0: i32, %arg1: memref<3xf32, #tpu.memory_space<smem>>, %arg2: memref<1x8x256xf32, #tpu.memory_space<vmem>>, %arg3: memref<1x8x256xf32, #tpu.memory_space<vmem>>) attributes {dimension_semantics = [#tpu.dimension_semantics<parallel>], iteration_bounds = array<i64: 2>, scalar_prefetch = 0 : i64, scratch_operands = 0 : i64, tpu.core_type = #tpu.core_type<tc>, window_params = [{transform_indices = @transform_0, window_bounds = array<i64: 3>}, {transform_indices = @transform_1, window_bounds = array<i64: 1, 8, 256>}, {transform_indices = @transform_2, window_bounds = array<i64: 1, 8, 256>}]} {
    %c0 = arith.constant 0 : index
    %c0_0 = arith.constant 0 : index
    %c0_1 = arith.constant 0 : index
    %0 = vector.load %arg2[%c0, %c0_0, %c0_1] : memref<1x8x256xf32, #tpu.memory_space<vmem>>, vector<1x8x256xf32>
    %cst = arith.constant dense<0.000000e+00> : vector<1x8xf32>
    %1 = vector.multi_reduction <add>, %0, %cst [2] : vector<1x8x256xf32> to vector<1x8xf32>
    %cst_2 = arith.constant 2.560000e+02 : f32
    %2 = vector.broadcast %cst_2 : f32 to vector<1x8xf32>
    %3 = arith.divf %1, %2 : vector<1x8xf32>
    %cst_3 = arith.constant 0.000000e+00 : f32
    %4 = vector.broadcast %cst_3 : f32 to vector<1x1xf32>
    %5 = tpu.concatenate %4, %3, %4 in 1 : vector<1x1xf32>, vector<1x8xf32>, vector<1x1xf32> -> vector<1x10xf32>
    %cst_4 = arith.constant 0.000000e+00 : f32
    %6 = vector.broadcast %cst_4 : f32 to vector<1x8xf32>
    %c0_5 = arith.constant 0 : index
    %7 = memref.load %arg1[%c0_5] : memref<3xf32, #tpu.memory_space<smem>>
    %8 = vector.extract_strided_slice %5 {offsets = [0, 0], sizes = [1, 8], strides = [1, 1]} : vector<1x10xf32> to vector<1x8xf32>
    %9 = vector.broadcast %7 : f32 to vector<1x8xf32>
    %10 = arith.mulf %9, %8 : vector<1x8xf32>
    %11 = arith.addf %6, %10 : vector<1x8xf32>
    %c1 = arith.constant 1 : index
    %12 = memref.load %arg1[%c1] : memref<3xf32, #tpu.memory_space<smem>>
    %13 = vector.extract_strided_slice %5 {offsets = [0, 1], sizes = [1, 8], strides = [1, 1]} : vector<1x10xf32> to vector<1x8xf32>
    %14 = vector.broadcast %12 : f32 to vector<1x8xf32>
    %15 = arith.mulf %14, %13 : vector<1x8xf32>
    %16 = arith.addf %11, %15 : vector<1x8xf32>
    %c2 = arith.constant 2 : index
    %17 = memref.load %arg1[%c2] : memref<3xf32, #tpu.memory_space<smem>>
    %18 = vector.extract_strided_slice %5 {offsets = [0, 2], sizes = [1, 8], strides = [1, 1]} : vector<1x10xf32> to vector<1x8xf32>
    %19 = vector.broadcast %17 : f32 to vector<1x8xf32>
    %20 = arith.mulf %19, %18 : vector<1x8xf32>
    %21 = arith.addf %16, %20 : vector<1x8xf32>
    %22 = arith.negf %21 : vector<1x8xf32>
    %23 = math.exp %22 : vector<1x8xf32>
    %cst_6 = arith.constant 1.000000e+00 : f32
    %24 = vector.broadcast %cst_6 : f32 to vector<1x8xf32>
    %25 = arith.addf %24, %23 : vector<1x8xf32>
    %26 = arith.divf %24, %25 : vector<1x8xf32>
    %27 = vector.shape_cast %26 : vector<1x8xf32> to vector<1x8x1xf32>
    %28 = vector.broadcast %27 : vector<1x8x1xf32> to vector<1x8x256xf32>
    %29 = arith.mulf %0, %28 : vector<1x8x256xf32>
    %c0_7 = arith.constant 0 : index
    %c0_8 = arith.constant 0 : index
    %c0_9 = arith.constant 0 : index
    %30 = vector.load %arg3[%c0_7, %c0_8, %c0_9] : memref<1x8x256xf32, #tpu.memory_space<vmem>>, vector<1x8x256xf32>
    tpu.vector_store %arg3[%c0_7, %c0_8, %c0_9], %29 {strides = array<i32>} : memref<1x8x256xf32, #tpu.memory_space<vmem>>, vector<1x8x256xf32>,
    return
  }
  func.func @transform_0(%arg0: i32) -> i32 {
    %c0_i32 = arith.constant 0 : i32
    %c0_i32_0 = arith.constant 0 : i32
    return %c0_i32 : i32
  }
  func.func @transform_1(%arg0: i32) -> (i32, i32, i32) {
    %c0_i32 = arith.constant 0 : i32
    %c0_i32_0 = arith.constant 0 : i32
    %c0_i32_1 = arith.constant 0 : i32
    return %arg0, %c0_i32, %c0_i32_0 : i32, i32, i32
  }
  func.func @transform_2(%arg0: i32) -> (i32, i32, i32) {
    %c0_i32 = arith.constant 0 : i32
    %c0_i32_0 = arith.constant 0 : i32
    %c0_i32_1 = arith.constant 0 : i32
    return %arg0, %c0_i32, %c0_i32_0 : i32, i32, i32
  }
}

</mosaic_0001>

<bundles_post_ra>
// kernel: tpu_custom_call.1
= control target key start
LH: loop header
LB: loop body
LE: loop exit
PB: predicated region body
PF: predicated region fallthrough
CT: control target
= control target key end

     0   :  { %7 = vsyncpa [#allocation5], 0  ;;  %s723_s0 = inlined_call_operand.hbm [shape: f32[3], index: 0, kind: input, shape index: {}]   ;;  %s724_s1 = inlined_call_operand.hbm [shape: f32[2,8,256], index: 1, kind: input, shape index: {}]   ;;  %s725_s2 = inlined_call_operand.hbm [shape: f32[2,8,256], index: 2, kind: output, shape index: {}]  }
   0x1   :  { %8 = vsyncpa [#allocation3], 0 }
   0x2   :  { %10 = vsyncpa [#allocation3 + $0x1], 0 }
   0x3   :  { %11 = vsyncpa [#allocation4], 0 }
   0x4   :  { %13 = vsyncpa [#allocation4 + $0x1], 0  ;;  %s573_s9 = smov 0   ;;  %s575_s10 = smov 0  }
   0x5   :  { %s577_s11 = smov 0   ;;  %s579_s12 = smov 0  }
   0x6 LB: > { %s594_s13 = sadd.s32 4294967295, %s552_s12   ;;  %s348_s14 = sadd.s32 4294967294, %s552_s12   ;;  %s552_s12 = sphi %s579_s12, %s735_s12   ;;  %s548_s11 = sphi %s577_s11, %s734_s11   ;;  %s544_s10 = sphi %s575_s10, %s733_s10   ;;  %s540_s9 = sphi %s573_s9, %s732_s9  }
   0x7   : > { %p60_p0 = scmp.ne.s32.totalorder %s544_s10, %s540_s9  ;;  %p61_p1 = scmp.eq.s32.totalorder %s594_s13, 0 }
   0x8   : > { %p84_p2 = scmp.eq.s32.totalorder %s594_s13, 1  ;;  %p90_p3 = scmp.eq.s32.totalorder %s348_s14, 1 }
   0x9   : > { %p603_p4 = por %p61_p1, %p60_p0  ;;  %p349_p5 = scmp.ge.s32.totalorder %s552_s12, 1 }
   0xa   : > { %p608_p6 = por %p90_p3, %p60_p0  ;;  %p97_p7 = scmp.lt.s32.totalorder %s552_s12, 3 }
   0xb   : > { %s109_s19 = sshll.u32 %s723_s0, 4  ;;  %s624_s21 = sadd.s32 1, %s552_s12   ;;  %s110_s19 = int_to_ptr.hbm [resolvable:$true] %s109_s19 }
   0xc   : > { %p616_p8 = pnand %p349_p5, %p97_p7  ;;  %s44_s22 = ssub.s32 %s552_s12, %s624_s21 }
   0xd   : > { %p45_p12 = scmp.eq.s32.totalorder %s44_s22, 0  ;;  %s47_s23 = sadd.s32 1, %s548_s11 }
   0xe   : > { %p377_p10 = pneg %p616_p8  ;;  %p54_p13 = scmp.ne.s32.totalorder %s548_s11, %s544_s10 }
   0xf   : > { %s554_s24 = smov [#allocation2]   ;;  %p55_p0 = scmp.eq.s32.totalorder %s552_s12, 0 }
  0x10   : > { %p378_p11 = pnand %p377_p10, %p61_p1  ;;  %p639_p3 = por %p84_p2, %p54_p13 }
  0x11   : > { %s634_s25 = scalar_select %p45_p12, %s548_s11, %s47_s23  }
  0x12   : > { %380 = dma.hbm_to_smem (!%p378_p11), %s110_s19, 16, %s554_s24, [#allocation5]  }
  0x13   : > { %s120_s27 = sand.u32 1, %s548_s11   ;;  %p56_p5 = por %p55_p0, %p54_p13 }
  0x14   : > { %p390_p7 = scmp.lt.s32.totalorder %s552_s12, 2  ;;  %s352_s28 = sshll.u32 %s120_s27, 4 }
  0x15   : > { %s367_s29 = sshll.u32 %s552_s12, 4  ;;  %s124_s6 = scalar_lea.vmem [#allocation6], %s352_s28 }
  0x16   : > { %s129_s4 = scalar_lea.hbm %s724_s1, %s367_s29  ;;  %s133_s7 = sshll.u32 %s124_s6, 4  ;;  %s134_s7 = int_to_ptr.vmem [resolvable:$true] %s133_s7 }
  0x17   : > { %s131_s5 = sshll.u32 %s129_s4, 4  ;;  %p649_p10 = pnand %p390_p7, %p56_p5  ;;  %s132_s5 = int_to_ptr.hbm [resolvable:$true] %s131_s5 }
  0x18   : > { %s121_s14 = scalar_lea.sflag [#allocation3], %s120_s27  ;;  %s452_s17 = sshra.s32 %s132_s5, 4  ;;  %s453_s17 = int_to_ptr.hbm [resolvable:$true] %s452_s17 }
  0x19   : > { %s454_s18 = scalar_lea.hbm %s453_s17, 16  ;;  %p456_p11 = pneg %p649_p10 }
  0x1a   : > { %p455_p2 = scmp.ne.s32.totalorder %s453_s17, %s454_s18  ;;  %s459_s23 = scalar_lea.hbm %s724_s1, 32 }
  0x1b   : > { %p460_p0 = scmp.lt.s32.totalorder %s453_s17, %s724_s1  ;;  %p461_p5 = scmp.lt.s32.totalorder %s459_s23, %s454_s18 }
  0x1c   : > { %p457_p12 = pnand %p456_p11, %p455_p2 }
  0x1d   : > { %p462_p7 = por %p461_p5, %p460_p0 }
  0x1e   : > { %p458_p13 = pneg %p457_p12 }
  0x20   : > { %p463_p9 = pnand %p462_p7, %p458_p13 }
  0x22   : > { %466 = shalt.err (!%p463_p9)
}
  0x23   : > { %384 = dma.hbm_to_vmem [thread:$0]  (!%p649_p10), %s132_s5, 256, %s134_s7, %s121_s14  }
  0x24   : > { %142 = sbr.rel (%p616_p8) target bundleno = 445 (0x1bd), region = 28 }
  0x29   : > { %527 = dma.done.wait (%p61_p1), [#allocation5], 16  }
  0x2a   : > { %529 = vsyncadd (%p61_p1), [#allocation5], 4294967280  ;;  %s670_s27 = sand.u32 1, %s544_s10  }
  0x2b   : > { %s357_s29 = sshll.u32 %s670_s27, 4  ;;  %s150_s30 = scalar_lea.sflag [#allocation3], %s670_s27 }
  0x2c   : > { %s153_s3 = scalar_lea.vmem [#allocation6], %s357_s29 }
  0x2d   : > { %531 = dma.done.wait (%p603_p4), %s150_s30, 256  }
  0x2e   : > { %533 = vsyncadd (%p603_p4), %s150_s30, 4294967040 }
  0x2f   : > { %159 = sfence }
  0x30   : > { %v680_v0 = vld [vmem:[%s153_s3] sm:$0xff]  ;;  %v682_v1 = vld [vmem:[%s153_s3 + $0x8] sm:$0xff]  ;;  %v555_v3 = vmov 256.0   ;;  %v190_v8 = vlaneseq  ;;  %s360_s15 = sld [smem:[#allocation2 + $0x2]]  ;;  %vm195_vm1 = vcmask 7168   ;;  %vm197_vm2 = vcmask 72704  }
  0x31   : > { %v178_v2 = vadd.f32 %v682_v1, %v680_v0  ;;  %431 = vrcp.f32 %v555_v3  ;;  %s359_s20 = sld [smem:[#allocation2 + $0x1]]  ;;  %s556_s4 = smov 126  }
  0x32   : > { %v191_v10 = vand.u32 127, %v190_v8  ;;  %s557_s5 = smov 127   ;;  %v240_v22 = vshrl.u32 %v190_v8, 7  ;;  %s199_s6 = sld [smem:[#allocation2]] }
  0x33   : > { %179 = vadd.xlane.f32.xlu0 %v178_v2  ;;  %s368_s7 = sshll.u32 %s594_s13, 4  ;;  %s175_s18 = scalar_lea.vmem [#allocation7], %s357_s29 }
  0x34   : > { %v192_v12 = vadd.s32 4294967295, %v191_v10  ;;  %429 = vset.pattern.permute.xlu1 %v240_v22  ;;  %430 = vset.pattern.permute.xlu0 %v240_v22  ;;  %s261_s17 = scalar_lea.hbm %s725_s2, %s368_s7  ;;  %s263_s19 = sshll.u32 %s175_s18, 4  ;;  %s264_s19 = int_to_ptr.vmem [resolvable:$true] %s263_s19 }
  0x35   : > { %s265_s22 = sshll.u32 %s261_s17, 4  ;;  %s250_s23 = scalar_lea.sflag [#allocation4], %s670_s27  ;;  %s266_s22 = int_to_ptr.hbm [resolvable:$true] %s265_s22 }
  0x36   : > { %v212_v16 = vstv %s360_s15  ;;  %s496_s13 = sshra.s32 %s266_s22, 4  ;;  %s502_s30 = scalar_lea.hbm %s725_s2, 32  ;;  %s497_s13 = int_to_ptr.hbm [resolvable:$true] %s496_s13 }
  0x37   : > { %v432_v4 = vpop.eup %431  ;;  %v204_v17 = vstv %s359_s20  ;;  %s498_s24 = scalar_lea.hbm %s497_s13, 16  ;;  %p503_p9 = scmp.lt.s32.totalorder %s497_s13, %s725_s2 }
  0x38   : > { %v182_v5 = vmul.f32 256.0, %v432_v4  ;;  %vm186_vm0 = vweird.f32 %v432_v4  ;;  %v200_v23 = vstv %s199_s6  ;;  %p499_p1 = scmp.ne.s32.totalorder %s497_s13, %s498_s24  ;;  %p504_p10 = scmp.lt.s32.totalorder %s502_s30, %s498_s24 }
  0x3a   : > { %v183_v6 = vsub.f32 1.0, %v182_v5  ;;  %p500_p4 = pnand %p499_p1, %p639_p3  ;;  %p505_p2 = por %p504_p10, %p503_p9 }
  0x3c   : > { %v184_v7 = vmul.f32 %v432_v4, %v183_v6  ;;  %p501_p8 = pneg %p500_p4 }
  0x3e   : > { %v185_v9 = vadd.f32 %v432_v4, %v184_v7  ;;  %p506_p11 = pnand %p505_p2, %p501_p8 }
  0x40   : > { %v187_v11 = vsel %vm186_vm0, %v432_v4, %v185_v9 }
  0xa6   : > { %v180_v13 = vpop.xlane.xlu0 %179 }
  0xa7   : > { %v188_v14 = vmul.f32 %v187_v11, %v180_v13 }
  0xa9   : > { %v193_v15 = vperm.slane %v188_v14, %v192_v12 }
  0xab   : > { %v196_v18 = vsel %vm195_vm1, 0.0, %v193_v15 }
  0xac   : > { %v198_v19 = vsel %vm197_vm2, %v196_v18, 0.0 }
  0xad   : > { %v213_v20 = vmul.f32 %v212_v16, %v198_v19  ;;  %v205_v21 = vmul.f32 %v204_v17, %v198_v19  ;;  %v201_v24 = vmul.f32 %v200_v23, %v198_v19 }
  0xaf   : > { %215 = vrot.lane.b32.xlu1 %v213_v20, %s556_s4  ;;  %207 = vrot.lane.b32.xlu0 %v205_v21, %s557_s5 }
 0x121   : > { %v208_v25 = vpop.permute.xlu0 %207  ;;  %v216_v27 = vpop.permute.xlu1 %215 }
 0x122   : > { %v210_v26 = vadd.f32 %v208_v25, %v201_v24 }
 0x124   : > { %v218_v28 = vadd.f32 %v216_v27, %v210_v26 }
 0x126   : > { %v361_v29 = vmul.f32 -1.442695, %v218_v28 }
 0x128   : > { %433 = vpow2.f32 %v361_v29 }
 0x12e   : > { %v434_v30 = vpop.eup %433 }
 0x12f   : > { %v222_v31 = vadd.f32 1.0, %v434_v30 }
 0x131   : > { %435 = vrcp.f32 %v222_v31  ;;  %v234_v35 = vand.u32 2147483648, %v222_v31  ;;  %v232_v37 = vand.u32 2147483647, %v222_v31  ;;  %vm228_vm4 = vweird.f32 %v222_v31 }
 0x133   : > { %v235_v39 = vor.u32 1.1754944e-38, %v234_v35  ;;  %vm233_vm6 = vcmp.eq.f32.partialorder %v232_v37, 8.507059e+37 }
 0x137   : > { %v436_v32 = vpop.eup %435 }
 0x138   : > { %v224_v33 = vmul.f32 %v436_v32, %v222_v31  ;;  %vm229_vm3 = vweird.f32 %v436_v32 }
 0x139   : > { %vm230_vm5 = vmor %vm228_vm4, %vm229_vm3 }
 0x13a   : > { %v225_v34 = vsub.f32 1.0, %v224_v33 }
 0x13c   : > { %v226_v36 = vmul.f32 %v436_v32, %v225_v34 }
 0x13e   : > { %v227_v38 = vadd.f32 %v436_v32, %v226_v36 }
 0x140   : > { %v231_v40 = vsel %vm230_vm5, %v436_v32, %v227_v38 }
 0x141   : > { %v236_v41 = vsel %vm233_vm6, %v235_v39, %v231_v40 }
 0x142   : > { %v238_v42 = vperm.slane %v236_v41, 0 }
 0x144   : > { %243 = vperm.xlu1 %429, %v238_v42  }
 0x1b6   : > { %v244_v43 = vpop.permute.xlu1 %243 }
 0x1b7   : > { %v245_v44 = vmul.f32 %v244_v43, %v680_v0  ;;  %v246_v45 = vmul.f32 %v244_v43, %v682_v1 }
 0x1b9   : > { %247 = vst [vmem:[%s175_s18] sm:$0xff] %v245_v44 }
 0x1ba   : > { %248 = vst [vmem:[%s175_s18 + $0x8] sm:$0xff] %v246_v45 }
 0x1bb   : > { %509 = shalt.err (!%p506_p11)
}
 0x1bc   : > { %375 = dma.vmem_to_hbm [thread:$0]  (%p639_p3), %s264_s19, 256, %s266_s22, %s250_s23  }
 0x1bd PF: > { %s277_s27 = sand.u32 1, %s540_s9   ;;  %p731_p12 = scmp.ge.s32.totalorder %s552_s12, 2 }
 0x1be   : > { %s278_s20 = scalar_lea.sflag [#allocation4], %s277_s27 }
 0x1bf   : > { %p386_p13 = pnand %p731_p12, %p608_p6 }
 0x1c1   : > { %p387_p0 = pneg %p386_p13 }
 0x1c3   : > { %535 = dma.done.wait (%p387_p0), %s278_s20, 256  }
 0x1c4   : > { %537 = vsyncadd (%p387_p0), %s278_s20, 4294967040  ;;  %p16_p5 = scmp.ge.s32.totalorder %s624_s21, 4   ;;  %s732_s9 = smov %s544_s10 }
 0x1c5   : > { %s733_s10 = smov %s548_s11  ;;  %s734_s11 = smov %s634_s25 }
 0x1c6   : > { %s735_s12 = smov %s624_s21  ;;  %18 = sbr.rel (!%p16_p5) target bundleno = 6 (0x6), region = 78 }
 0x1cb   :  { %284 = vsyncpa [#allocation3], 1 }
 0x1cc   :  { %286 = vsyncpa [#allocation3 + $0x1], 1 }
 0x1cd   :  { %287 = vsyncpa [#allocation4], 1 }
 0x1ce   :  { %289 = vsyncpa [#allocation4 + $0x1], 1 }
 0x1cf   :  { %290 = vsyncpa [#allocation5], 1 }
 0x1d0   :  { %292 = vsyncpa [#allocation5 + $0x1], 1 }

</bundles_post_ra>
